<compile_context>
chip_gen: v7x
topology: tpu7x:2x2x1
jax: 0.10.0
libtpu: 0.0.40
codegen_flags: <defaults>
</compile_context>

<pallas_src>
import functools

import jax
import jax.numpy as jnp
from jax import lax
from jax.experimental import pallas as pl
from jax.experimental.pallas import tpu as pltpu


def _residual_dwconv_bn_kernel(x_ref, w_ref, b_ref, o_ref, *, TH, W):
    """One (batch, channel-tile, row-strip) block.

    x_ref : (H+2, W+2, TC)  zero-halo-padded input, resident across row strips
    w_ref : (3, 3, TC)      depthwise weights with BN scale pre-folded
    b_ref : (1, 1, TC)      folded BN bias
    o_ref : (TH, W, TC)     output row strip
    """
    h = pl.program_id(2)
    row0 = pl.multiple_of(h * TH, TH)          # first padded row of this strip

    wv = w_ref[...].astype(jnp.float32)        # (3, 3, TC)
    bias = b_ref[...].astype(jnp.float32)      # (1, 1, TC)

    # Centre-column window (padded rows row0 .. row0+TH+1, cols 1 .. W).
    # Its middle TH rows are exactly the residual input x for this strip.
    win_c = x_ref[pl.ds(row0, TH + 2), pl.ds(1, W), :].astype(jnp.float32)
    mid = win_c[1:-1]                                          # (TH, W, TC)

    # Accumulator starts at residual + folded BN bias (no zeros tile, no
    # separate bias/residual adds at the end).
    acc = mid + bias
    acc = acc + win_c[:-2] * wv[0, 1] + mid * wv[1, 1] + win_c[2:] * wv[2, 1]

    # Left / right tap columns: one shifted window load each (the halo columns
    # in HBM supply the zero padding); H taps are free leading-dim row slices.
    # TODO(synk): a pltpu.roll(axis=1)-based W shift of a single window would
    # move the column shift onto the XLU and drop these two extra window loads.
    for j in (0, 2):
        win = x_ref[pl.ds(row0, TH + 2), pl.ds(j, W), :].astype(jnp.float32)
        acc = acc + win[:-2] * wv[0, j] + win[1:-1] * wv[1, j] + win[2:] * wv[2, j]

    o_ref[...] = acc.astype(o_ref.dtype)


def _pick_row_strip(H):
    """Largest divisor of H in [4, 32] that leaves >= 2 strips; else full H."""
    best = H
    for th in range(4, min(H // 2, 32) + 1):
        if H % th == 0:
            best = th
    return best


def _pick_channel_tile(C):
    """Full C unless it is a large multiple of 128 (lane-dense, no ragged tail)."""
    if C % 128 != 0 or C <= 512:
        return C
    return 256 if C % 256 == 0 else 128


def residual_dwconv_bn(x_nchw, w_dw, bn_gamma, bn_beta, bn_mean, bn_var,
                       eps=1e-5):
    """x_nchw: (N, C, H, W); w_dw: (C, 1, 3, 3) PyTorch depthwise layout."""
    N, C, H, W = x_nchw.shape

    # ---- glue: layout + halo + BN folding (plain JAX) ----
    # NCHW -> NHWC (channels in lanes) plus a 1-pixel zero halo; XLA fuses the
    # pad into the transpose copy, so no extra HBM pass beyond the transpose
    # needed to match PyTorch's layout.
    # TODO(synk): keep activations NHWC across the surrounding model to drop
    # this transpose copy entirely (it dominates HBM traffic for this op).
    x = jnp.transpose(x_nchw, (0, 2, 3, 1))                       # (N, H, W, C)
    x_pad = jnp.pad(x, ((0, 0), (1, 1), (1, 1), (0, 0)))          # (N, H+2, W+2, C)

    inv_std = 1.0 / jnp.sqrt(bn_var.astype(jnp.float32) + eps)
    scale = bn_gamma.astype(jnp.float32) * inv_std                # (C,)
    # Fold BN scale into the depthwise weights; only a bias add stays in-kernel.
    w = jnp.transpose(w_dw[:, 0, :, :], (1, 2, 0)).astype(jnp.float32) * scale
    bias = (bn_beta.astype(jnp.float32)
            - bn_mean.astype(jnp.float32) * scale).reshape(1, 1, C)

    TC = _pick_channel_tile(C)
    TH = _pick_row_strip(H)
    grid = (N, pl.cdiv(C, TC), H // TH)

    kernel = functools.partial(_residual_dwconv_bn_kernel, TH=TH, W=W)

    out_nhwc = pl.pallas_call(
        kernel,
        out_shape=jax.ShapeDtypeStruct((N, H, W, C), x.dtype),
        grid_spec=pltpu.PrefetchScalarGridSpec(
            num_scalar_prefetch=0,
            grid=grid,
            in_specs=[
                # Padded input: block index ignores the (innermost) row-strip
                # axis, so it stays resident and is fetched once per (n, c).
                pl.BlockSpec((None, H + 2, W + 2, TC),
                             lambda n, c, h: (n, 0, 0, c)),
                pl.BlockSpec((3, 3, TC), lambda n, c, h: (0, 0, c)),
                pl.BlockSpec((1, 1, TC), lambda n, c, h: (0, 0, c)),
            ],
            out_specs=pl.BlockSpec((None, TH, W, TC),
                                   lambda n, c, h: (n, h, 0, c)),
        ),
        compiler_params=pltpu.CompilerParams(
            dimension_semantics=("parallel", "parallel", "parallel"),
            vmem_limit_bytes=32 * 1024 * 1024),
    )(x_pad, w, bias)

    return jnp.transpose(out_nhwc, (0, 3, 1, 2))                  # back to NCHW


def _reference(x_nchw, w_dw, bn_gamma, bn_beta, bn_mean, bn_var, eps=1e-5):
    """Pure-JAX reference: x + BN(depthwise_conv3x3(x)), NCHW."""
    C = x_nchw.shape[1]
    conv = lax.conv_general_dilated(
        x_nchw, w_dw,
        window_strides=(1, 1), padding=((1, 1), (1, 1)),
        dimension_numbers=("NCHW", "OIHW", "NCHW"),
        feature_group_count=C,
        precision=lax.Precision.HIGHEST)
    scale = (bn_gamma / jnp.sqrt(bn_var + eps)).reshape(1, C, 1, 1)
    bias = (bn_beta - bn_mean * bn_gamma / jnp.sqrt(bn_var + eps)).reshape(1, C, 1, 1)
    return x_nchw + conv * scale + bias


if __name__ == "__main__":
    key = jax.random.PRNGKey(0)

    # (N, C, H, W) test shapes: the small primary case plus one RepViT-like case.
    for (N, C, H, W) in [(2, 4, 16, 16), (1, 48, 28, 28)]:
        k_x, k_w, k_g, k_b, k_m, k_v, key = jax.random.split(key, 7)
        x = jax.random.normal(k_x, (N, C, H, W), dtype=jnp.float32)
        # Depthwise Conv2d(C, C, ks=3, pad=1, groups=C, bias=False): (C,1,3,3)
        w_dw = jax.random.normal(k_w, (C, 1, 3, 3), dtype=jnp.float32) * 0.1
        # BatchNorm2d(C) in inference mode (non-trivial stats to exercise folding).
        bn_gamma = 1.0 + 0.1 * jax.random.normal(k_g, (C,), dtype=jnp.float32)
        bn_beta = 0.1 * jax.random.normal(k_b, (C,), dtype=jnp.float32)
        bn_mean = 0.1 * jax.random.normal(k_m, (C,), dtype=jnp.float32)
        bn_var = jnp.abs(1.0 + 0.1 * jax.random.normal(k_v, (C,), dtype=jnp.float32))
        # TODO(synk): training-mode stochastic depth branch (torch.rand().ge_(drop))
        # is not implemented; eval-mode forward (drop inactive) is reproduced.

        out = residual_dwconv_bn(x, w_dw, bn_gamma, bn_beta, bn_mean, bn_var)
        out = jax.block_until_ready(out)

        ref = _reference(x, w_dw, bn_gamma, bn_beta, bn_mean, bn_var)
        assert out.shape == (N, C, H, W)
        assert jnp.allclose(out, ref, atol=2e-5, rtol=2e-5), \
            f"mismatch vs reference at shape {(N, C, H, W)}"

    print("KERNEL_OK")
</pallas_src>

<mosaic_0001>
module attributes {stable_mosaic.version = 11 : i64} {
  func.func @_residual_dwconv_bn_kernel(%arg0: i32, %arg1: i32, %arg2: i32, %arg3: memref<1x18x18x4xf32, #tpu.memory_space<vmem>>, %arg4: memref<3x3x4xf32, #tpu.memory_space<vmem>>, %arg5: memref<1x1x4xf32, #tpu.memory_space<vmem>>, %arg6: memref<1x8x16x4xf32, #tpu.memory_space<vmem>>) attributes {dimension_semantics = [#tpu.dimension_semantics<parallel>, #tpu.dimension_semantics<parallel>, #tpu.dimension_semantics<parallel>], iteration_bounds = array<i64: 2, 1, 2>, scalar_prefetch = 0 : i64, scratch_operands = 0 : i64, tpu.core_type = #tpu.core_type<tc>, window_params = [{transform_indices = @transform_0, window_bounds = array<i64: 1, 18, 18, 4>}, {transform_indices = @transform_1, window_bounds = array<i64: 3, 3, 4>}, {transform_indices = @transform_2, window_bounds = array<i64: 1, 1, 4>}, {transform_indices = @transform_3, window_bounds = array<i64: 1, 8, 16, 4>}]} {
    %c8_i32 = arith.constant 8 : i32
    %0 = arith.muli %arg2, %c8_i32 : i32
    %1 = tpu.assume_multiple %0, 8 : i32
    %c0 = arith.constant 0 : index
    %c0_0 = arith.constant 0 : index
    %c0_1 = arith.constant 0 : index
    %2 = vector.load %arg4[%c0, %c0_0, %c0_1] : memref<3x3x4xf32, #tpu.memory_space<vmem>>, vector<3x3x4xf32>
    %c0_2 = arith.constant 0 : index
    %c0_3 = arith.constant 0 : index
    %c0_4 = arith.constant 0 : index
    %3 = vector.load %arg5[%c0_2, %c0_3, %c0_4] : memref<1x1x4xf32, #tpu.memory_space<vmem>>, vector<1x1x4xf32>
    %c0_5 = arith.constant 0 : index
    %4 = arith.index_cast %1 : i32 to index
    %c1 = arith.constant 1 : index
    %c0_6 = arith.constant 0 : index
    %5 = vector.load %arg3[%c0_5, %4, %c1, %c0_6] : memref<1x18x18x4xf32, #tpu.memory_space<vmem>>, vector<1x10x16x4xf32>
    %6 = vector.shape_cast %5 : vector<1x10x16x4xf32> to vector<10x16x4xf32>
    %7 = vector.extract_strided_slice %6 {offsets = [1, 0, 0], sizes = [8, 16, 4], strides = [1, 1, 1]} : vector<10x16x4xf32> to vector<8x16x4xf32>
    %8 = vector.broadcast %3 : vector<1x1x4xf32> to vector<8x16x4xf32>
    %9 = arith.addf %7, %8 : vector<8x16x4xf32>
    %10 = vector.extract_strided_slice %6 {offsets = [0, 0, 0], sizes = [8, 16, 4], strides = [1, 1, 1]} : vector<10x16x4xf32> to vector<8x16x4xf32>
    %11 = vector.extract_strided_slice %2 {offsets = [0, 1, 0], sizes = [1, 1, 4], strides = [1, 1, 1]} : vector<3x3x4xf32> to vector<1x1x4xf32>
    %12 = vector.shape_cast %11 : vector<1x1x4xf32> to vector<4xf32>
    %13 = vector.shape_cast %12 : vector<4xf32> to vector<1x1x4xf32>
    %14 = vector.broadcast %13 : vector<1x1x4xf32> to vector<8x16x4xf32>
    %15 = arith.mulf %10, %14 : vector<8x16x4xf32>
    %16 = arith.addf %9, %15 : vector<8x16x4xf32>
    %17 = vector.extract_strided_slice %2 {offsets = [1, 1, 0], sizes = [1, 1, 4], strides = [1, 1, 1]} : vector<3x3x4xf32> to vector<1x1x4xf32>
    %18 = vector.shape_cast %17 : vector<1x1x4xf32> to vector<4xf32>
    %19 = vector.shape_cast %18 : vector<4xf32> to vector<1x1x4xf32>
    %20 = vector.broadcast %19 : vector<1x1x4xf32> to vector<8x16x4xf32>
    %21 = arith.mulf %7, %20 : vector<8x16x4xf32>
    %22 = arith.addf %16, %21 : vector<8x16x4xf32>
    %23 = vector.extract_strided_slice %6 {offsets = [2, 0, 0], sizes = [8, 16, 4], strides = [1, 1, 1]} : vector<10x16x4xf32> to vector<8x16x4xf32>
    %24 = vector.extract_strided_slice %2 {offsets = [2, 1, 0], sizes = [1, 1, 4], strides = [1, 1, 1]} : vector<3x3x4xf32> to vector<1x1x4xf32>
    %25 = vector.shape_cast %24 : vector<1x1x4xf32> to vector<4xf32>
    %26 = vector.shape_cast %25 : vector<4xf32> to vector<1x1x4xf32>
    %27 = vector.broadcast %26 : vector<1x1x4xf32> to vector<8x16x4xf32>
    %28 = arith.mulf %23, %27 : vector<8x16x4xf32>
    %29 = arith.addf %22, %28 : vector<8x16x4xf32>
    %c0_7 = arith.constant 0 : index
    %30 = arith.index_cast %1 : i32 to index
    %c0_8 = arith.constant 0 : index
    %c0_9 = arith.constant 0 : index
    %31 = vector.load %arg3[%c0_7, %30, %c0_8, %c0_9] : memref<1x18x18x4xf32, #tpu.memory_space<vmem>>, vector<1x10x16x4xf32>
    %32 = vector.shape_cast %31 : vector<1x10x16x4xf32> to vector<10x16x4xf32>
    %33 = vector.extract_strided_slice %32 {offsets = [0, 0, 0], sizes = [8, 16, 4], strides = [1, 1, 1]} : vector<10x16x4xf32> to vector<8x16x4xf32>
    %34 = vector.extract_strided_slice %2 {offsets = [0, 0, 0], sizes = [1, 1, 4], strides = [1, 1, 1]} : vector<3x3x4xf32> to vector<1x1x4xf32>
    %35 = vector.shape_cast %34 : vector<1x1x4xf32> to vector<4xf32>
    %36 = vector.shape_cast %35 : vector<4xf32> to vector<1x1x4xf32>
    %37 = vector.broadcast %36 : vector<1x1x4xf32> to vector<8x16x4xf32>
    %38 = arith.mulf %33, %37 : vector<8x16x4xf32>
    %39 = arith.addf %29, %38 : vector<8x16x4xf32>
    %40 = vector.extract_strided_slice %32 {offsets = [1, 0, 0], sizes = [8, 16, 4], strides = [1, 1, 1]} : vector<10x16x4xf32> to vector<8x16x4xf32>
    %41 = vector.extract_strided_slice %2 {offsets = [1, 0, 0], sizes = [1, 1, 4], strides = [1, 1, 1]} : vector<3x3x4xf32> to vector<1x1x4xf32>
    %42 = vector.shape_cast %41 : vector<1x1x4xf32> to vector<4xf32>
    %43 = vector.shape_cast %42 : vector<4xf32> to vector<1x1x4xf32>
    %44 = vector.broadcast %43 : vector<1x1x4xf32> to vector<8x16x4xf32>
    %45 = arith.mulf %40, %44 : vector<8x16x4xf32>
    %46 = arith.addf %39, %45 : vector<8x16x4xf32>
    %47 = vector.extract_strided_slice %32 {offsets = [2, 0, 0], sizes = [8, 16, 4], strides = [1, 1, 1]} : vector<10x16x4xf32> to vector<8x16x4xf32>
    %48 = vector.extract_strided_slice %2 {offsets = [2, 0, 0], sizes = [1, 1, 4], strides = [1, 1, 1]} : vector<3x3x4xf32> to vector<1x1x4xf32>
    %49 = vector.shape_cast %48 : vector<1x1x4xf32> to vector<4xf32>
    %50 = vector.shape_cast %49 : vector<4xf32> to vector<1x1x4xf32>
    %51 = vector.broadcast %50 : vector<1x1x4xf32> to vector<8x16x4xf32>
    %52 = arith.mulf %47, %51 : vector<8x16x4xf32>
    %53 = arith.addf %46, %52 : vector<8x16x4xf32>
    %c0_10 = arith.constant 0 : index
    %54 = arith.index_cast %1 : i32 to index
    %c2 = arith.constant 2 : index
    %c0_11 = arith.constant 0 : index
    %55 = vector.load %arg3[%c0_10, %54, %c2, %c0_11] : memref<1x18x18x4xf32, #tpu.memory_space<vmem>>, vector<1x10x16x4xf32>
    %56 = vector.shape_cast %55 : vector<1x10x16x4xf32> to vector<10x16x4xf32>
    %57 = vector.extract_strided_slice %56 {offsets = [0, 0, 0], sizes = [8, 16, 4], strides = [1, 1, 1]} : vector<10x16x4xf32> to vector<8x16x4xf32>
    %58 = vector.extract_strided_slice %2 {offsets = [0, 2, 0], sizes = [1, 1, 4], strides = [1, 1, 1]} : vector<3x3x4xf32> to vector<1x1x4xf32>
    %59 = vector.shape_cast %58 : vector<1x1x4xf32> to vector<4xf32>
    %60 = vector.shape_cast %59 : vector<4xf32> to vector<1x1x4xf32>
    %61 = vector.broadcast %60 : vector<1x1x4xf32> to vector<8x16x4xf32>
    %62 = arith.mulf %57, %61 : vector<8x16x4xf32>
    %63 = arith.addf %53, %62 : vector<8x16x4xf32>
    %64 = vector.extract_strided_slice %56 {offsets = [1, 0, 0], sizes = [8, 16, 4], strides = [1, 1, 1]} : vector<10x16x4xf32> to vector<8x16x4xf32>
    %65 = vector.extract_strided_slice %2 {offsets = [1, 2, 0], sizes = [1, 1, 4], strides = [1, 1, 1]} : vector<3x3x4xf32> to vector<1x1x4xf32>
    %66 = vector.shape_cast %65 : vector<1x1x4xf32> to vector<4xf32>
    %67 = vector.shape_cast %66 : vector<4xf32> to vector<1x1x4xf32>
    %68 = vector.broadcast %67 : vector<1x1x4xf32> to vector<8x16x4xf32>
    %69 = arith.mulf %64, %68 : vector<8x16x4xf32>
    %70 = arith.addf %63, %69 : vector<8x16x4xf32>
    %71 = vector.extract_strided_slice %56 {offsets = [2, 0, 0], sizes = [8, 16, 4], strides = [1, 1, 1]} : vector<10x16x4xf32> to vector<8x16x4xf32>
    %72 = vector.extract_strided_slice %2 {offsets = [2, 2, 0], sizes = [1, 1, 4], strides = [1, 1, 1]} : vector<3x3x4xf32> to vector<1x1x4xf32>
    %73 = vector.shape_cast %72 : vector<1x1x4xf32> to vector<4xf32>
    %74 = vector.shape_cast %73 : vector<4xf32> to vector<1x1x4xf32>
    %75 = vector.broadcast %74 : vector<1x1x4xf32> to vector<8x16x4xf32>
    %76 = arith.mulf %71, %75 : vector<8x16x4xf32>
    %77 = arith.addf %70, %76 : vector<8x16x4xf32>
    %c0_12 = arith.constant 0 : index
    %c0_13 = arith.constant 0 : index
    %c0_14 = arith.constant 0 : index
    %c0_15 = arith.constant 0 : index
    %78 = vector.load %arg6[%c0_12, %c0_13, %c0_14, %c0_15] : memref<1x8x16x4xf32, #tpu.memory_space<vmem>>, vector<1x8x16x4xf32>
    %79 = vector.shape_cast %78 : vector<1x8x16x4xf32> to vector<8x16x4xf32>
    %80 = vector.shape_cast %77 : vector<8x16x4xf32> to vector<1x8x16x4xf32>
    tpu.vector_store %arg6[%c0_12, %c0_13, %c0_14, %c0_15], %80 {strides = array<i32>} : memref<1x8x16x4xf32, #tpu.memory_space<vmem>>, vector<1x8x16x4xf32>,
    return
  }
  func.func @transform_0(%arg0: i32, %arg1: i32, %arg2: i32) -> (i32, i32, i32, i32) {
    %c0_i32 = arith.constant 0 : i32
    %c0_i32_0 = arith.constant 0 : i32
    %c0_i32_1 = arith.constant 0 : i32
    return %arg0, %c0_i32, %c0_i32_0, %arg1 : i32, i32, i32, i32
  }
  func.func @transform_1(%arg0: i32, %arg1: i32, %arg2: i32) -> (i32, i32, i32) {
    %c0_i32 = arith.constant 0 : i32
    %c0_i32_0 = arith.constant 0 : i32
    %c0_i32_1 = arith.constant 0 : i32
    return %c0_i32, %c0_i32_0, %arg1 : i32, i32, i32
  }
  func.func @transform_2(%arg0: i32, %arg1: i32, %arg2: i32) -> (i32, i32, i32) {
    %c0_i32 = arith.constant 0 : i32
    %c0_i32_0 = arith.constant 0 : i32
    %c0_i32_1 = arith.constant 0 : i32
    return %c0_i32, %c0_i32_0, %arg1 : i32, i32, i32
  }
  func.func @transform_3(%arg0: i32, %arg1: i32, %arg2: i32) -> (i32, i32, i32, i32) {
    %c0_i32 = arith.constant 0 : i32
    %c0_i32_0 = arith.constant 0 : i32
    return %arg0, %arg2, %c0_i32, %arg1 : i32, i32, i32, i32
  }
}

</mosaic_0001>

<bundles_post_ra>
// kernel: tpu_custom_call.1
= control target key start
LH: loop header
LB: loop body
LE: loop exit
PB: predicated region body
PF: predicated region fallthrough
CT: control target
= control target key end

     0   :  { %s939_s12 = smov 0   ;;  %s941_s13 = smov 0   ;;  %s1497_s0 = inlined_call_operand.vmem [shape: f32[2,18,18,4], index: 0, kind: input, shape index: {}]   ;;  %s1498_s1 = inlined_call_operand.vmem [shape: f32[3,3,4], index: 1, kind: input, shape index: {}]   ;;  %s1499_s2 = inlined_call_operand.vmem [shape: f32[1,1,4], index: 2, kind: input, shape index: {}]   ;;  %s1500_s3 = inlined_call_operand.vmem [shape: f32[2,16,16,4], index: 3, kind: output, shape index: {}]  }
   0x1   :  { %s943_s14 = smov 0   ;;  %s945_s15 = smov 0  }
   0x2   :  { %s947_s16 = smov 0  }
   0x3 LB: > { %s25_s17 = sadd.s32 1, %s909_s14  ;;  %s32_s18 = sadd.s32 1, %s913_s15  ;;  %s917_s16 = sphi %s947_s16, %s13_s16   ;;  %s913_s15 = sphi %s945_s15, %s1505_s15   ;;  %s909_s14 = sphi %s943_s14, %s1504_s14   ;;  %s905_s13 = sphi %s941_s13, %s1503_s13   ;;  %s901_s12 = sphi %s939_s12, %s1502_s12  }
   0x4   : > { %p26_p0 = scmp.ge.s32.totalorder %s25_s17, 2  ;;  %p827_p1 = scmp.ge.s32.totalorder %s917_s16, 1 }
   0x5   : > { %p182_p2 = scmp.lt.s32.totalorder %s917_s16, 5 }
   0x6   : > { %s1507_s17 = smov (%p26_p0, %s25_s17), 0  ;;  %s1509_s18 = smov (!%p26_p0, %s32_s18), %s913_s15 }
   0x7   : > { %p183_p3 = pnand %p827_p1, %p182_p2  ;;  %p34_p4 = scmp.ge.s32.totalorder %s1509_s18, 2 }
   0x8   : > { %p224_p5 = scmp.lt.s32.totalorder (!%p183_p3), %s905_s13, 1  ;;  %v302_v0 = vlaneseq (!%p183_p3)  ;;  %v254_v2 = vld [vmem:[%s1498_s1] sm:$0x7] (!%p183_p3)  ;;  %v255_v3 = vld [vmem:[%s1498_s1 + $0x4] sm:$0x7] (!%p183_p3)  ;;  %s834_s23 = smul.u32 (!%p183_p3), 192, %s901_s12 }
   0x9   : > { %s1511_s18 = smov (%p34_p4, %s1509_s18), 0  ;;  %186 = sbr.rel (%p183_p3) target bundleno = 109 (0x6d), region = 32 }
   0xa   : > { %v303_v1 = vshrl.u32 (!%p183_p3), %v302_v0, 7  ;;  %v256_v4 = vld [vmem:[%s1498_s1 + $0x8] sm:$0x7] (!%p183_p3)  ;;  %s829_s30 = sshll.u32 (!%p183_p3), %s901_s12, 3  ;;  %v991_v8 = vld [vmem:[%s1499_s2] ss:$0 sm:$0xff] (!%p183_p3) }
   0xb   : > { %p1013_p6 = scmp.lt.s32.totalorder (!%p183_p3), %s829_s30, 15  ;;  %vm666_vm0 = vcmask (!%p183_p3), 31744  }
   0xc   : > { %v304_v5 = vsub.s32 (!%p183_p3), 1, %v303_v1  ;;  %v432_v6 = vsub.s32 (!%p183_p3), 0, %v303_v1  ;;  %v560_v7 = vsub.s32 (!%p183_p3), 2, %v303_v1 }
   0xe   : > { %v993_v9 = vrot.slane (!%p183_p3), %v254_v2, %v304_v5  ;;  %v995_v10 = vrot.slane (!%p183_p3), %v255_v3, %v304_v5  ;;  %v999_v11 = vrot.slane (!%p183_p3), %v256_v4, %v304_v5  ;;  %v1001_v12 = vrot.slane (!%p183_p3), %v254_v2, %v432_v6 }
   0xf   : > { %v1003_v13 = vrot.slane (!%p183_p3), %v255_v3, %v432_v6  ;;  %v1007_v16 = vrot.slane (!%p183_p3), %v256_v4, %v432_v6  ;;  %v1009_v17 = vrot.slane (!%p183_p3), %v254_v2, %v560_v7  ;;  %v1021_v22 = vrot.slane (!%p183_p3), %v255_v3, %v560_v7 }
  0x10   : > { %s1513_s13 = smov (!%p224_p5, %s905_s13), 1  ;;  %v1028_v26 = vrot.slane %v256_v4, %v560_v7  ;;  %s1515_s30 = smov (!%p1013_p6, %s829_s30), 15 }
  0x11   : > { %s838_s24 = smul.u32 432, %s1513_s13  ;;  %s830_s8 = sshll.u32 %s1515_s30, 1 }
  0x12   : > { %s831_s9 = sshll.u32 %s1513_s13, 5 }
  0x13   : > { %s231_s29 = scalar_lea.vmem %s1497_s0, %s838_s24  ;;  %s1109_s10 = sadd.s32 %s831_s9, %s830_s8 }
  0x14   : > { %s997_s6 = scalar_lea.vmem %s231_s29, %s834_s23  ;;  %s832_s11 = sshll.u32 %s1109_s10, 3 }
  0x15   : > { %v260_v14 = vld [vmem:[%s997_s6 + $0x1] sm:$0xff]  ;;  %v262_v15 = vld [vmem:[%s997_s6 + $0x19] sm:$0xff]  ;;  %v1024_v23 = vld [vmem:[%s997_s6 + $0x31] sm:$0xff]  ;;  %s1144_s19 = scalar_lea.vmem %s1500_s3, %s832_s11 }
  0x16   : > { %v286_v18 = vadd.f32 %v991_v8, %v262_v15  ;;  %v306_v19 = vmul.f32 %v993_v9, %v260_v14  ;;  %v342_v20 = vmul.f32 %v995_v10, %v262_v15  ;;  %v410_v21 = vld [vmem:[%s997_s6] sm:$0xff]  ;;  %v412_v24 = vld [vmem:[%s997_s6 + $0x18] sm:$0xff]  ;;  %v378_v28 = vmul.f32 %v999_v11, %v1024_v23  ;;  %v1033_v29 = vld [vmem:[%s997_s6 + $0x30] sm:$0xff] }
  0x17   : > { %v538_v25 = vld [vmem:[%s997_s6 + $0x2] sm:$0xff]  ;;  %v434_v30 = vmul.f32 %v1001_v12, %v410_v21  ;;  %v470_v31 = vmul.f32 %v1003_v13, %v412_v24  ;;  %v506_v34 = vmul.f32 %v1007_v16, %v1033_v29  ;;  %v540_v35 = vld [vmem:[%s997_s6 + $0x1a] sm:$0xff]  ;;  %v1053_v41 = vld [vmem:[%s997_s6 + $0x32] sm:$0xff]  ;;  %v288_v46 = vadd.f32 %v991_v8, %v1024_v23 }
  0x18   : > { %v322_v27 = vadd.f32 %v306_v19, %v286_v18  ;;  %v261_v32 = vld [vmem:[%s997_s6 + $0x9] sm:$0xff]  ;;  %v263_v33 = vld [vmem:[%s997_s6 + $0x21] sm:$0xff]  ;;  %v562_v42 = vmul.f32 %v1009_v17, %v538_v25  ;;  %v598_v43 = vmul.f32 %v1021_v22, %v540_v35  ;;  %v1058_v44 = vld [vmem:[%s997_s6 + $0x39] sm:$0xff]  ;;  %v1065_v47 = vmul.f32 %v1028_v26, %v1053_v41 }
  0x19   : > { %v287_v36 = vadd.f32 %v991_v8, %v263_v33  ;;  %v307_v37 = vmul.f32 %v993_v9, %v261_v32  ;;  %v343_v38 = vmul.f32 %v995_v10, %v263_v33  ;;  %v411_v39 = vld [vmem:[%s997_s6 + $0x8] sm:$0xff]  ;;  %v379_v49 = vmul.f32 %v999_v11, %v1058_v44  ;;  %v413_v50 = vld [vmem:[%s997_s6 + $0x20] sm:$0xff]  ;;  %v1072_v53 = vld [vmem:[%s997_s6 + $0x38] sm:$0xff] }
  0x1a   : > { %v358_v40 = vadd.f32 %v342_v20, %v322_v27  ;;  %v539_v45 = vld [vmem:[%s997_s6 + $0xa] sm:$0xff]  ;;  %v435_v51 = vmul.f32 %v1001_v12, %v411_v39  ;;  %v471_v54 = vmul.f32 %v1003_v13, %v413_v50  ;;  %v541_v55 = vld [vmem:[%s997_s6 + $0x22] sm:$0xff]  ;;  %v308_v56 = vmul.f32 %v993_v9, %v262_v15  ;;  %v1082_v60 = vld [vmem:[%s997_s6 + $0x3a] sm:$0xff] }
  0x1b   : > { %v323_v48 = vadd.f32 %v307_v37, %v287_v36  ;;  %v344_v57 = vmul.f32 %v995_v10, %v1024_v23  ;;  %v507_v59 = vmul.f32 %v1007_v16, %v1072_v53  ;;  %v563_v61 = vmul.f32 %v1009_v17, %v539_v45  ;;  %v1087_v63 = vld [vmem:[%s997_s6 + $0x49] sm:$0xff]  ;;  %v1105_v20 = vld [vmem:[%s997_s6 + $0x51] sm:$0xff] }
  0x1c   : > { %v394_v52 = vadd.f32 %v378_v28, %v358_v40  ;;  %v599_v62 = vmul.f32 %v1021_v22, %v541_v55  ;;  %v635_v1 = vmul.f32 %v1028_v26, %v1082_v60  ;;  %v324_v2 = vadd.f32 %v308_v56, %v288_v46  ;;  %v1100_v18 = vld [vmem:[%s997_s6 + $0x48] sm:$0xff] }
  0x1d   : > { %v359_v58 = vadd.f32 %v343_v38, %v323_v48  ;;  %v380_v3 = vmul.f32 %v999_v11, %v1087_v63  ;;  %v436_v5 = vmul.f32 %v1001_v12, %v412_v24  ;;  %v289_v6 = vadd.f32 %v991_v8, %v1058_v44  ;;  %v1116_v32 = vld [vmem:[%s997_s6 + $0x4a] sm:$0xff] }
  0x1e   : > { %v450_v0 = vadd.f32 %v434_v30, %v394_v52  ;;  %v309_v7 = vmul.f32 %v993_v9, %v263_v33  ;;  %v360_v15 = vadd.f32 %v344_v57, %v324_v2  ;;  %v472_v19 = vmul.f32 %v1003_v13, %v1033_v29  ;;  %v1132_v52 = vld [vmem:[%s997_s6 + $0x61] sm:$0xff] }
  0x1f   : > { %v395_v4 = vadd.f32 %v379_v49, %v359_v58  ;;  %v345_v21 = vmul.f32 %v995_v10, %v1058_v44  ;;  %v508_v25 = vmul.f32 %v1007_v16, %v1100_v18  ;;  %v381_v28 = vmul.f32 %v999_v11, %v1105_v20 }
  0x20   : > { %v486_v14 = vadd.f32 %v470_v31, %v450_v0  ;;  %v325_v27 = vadd.f32 %v309_v7, %v289_v6  ;;  %v396_v31 = vadd.f32 %v380_v3, %v360_v15  ;;  %v564_v33 = vmul.f32 %v1009_v17, %v540_v35  ;;  %v1159_v15 = vld [vmem:[%s997_s6 + $0x60] sm:$0xff] }
  0x21   : > { %v451_v24 = vadd.f32 %v435_v51, %v395_v4  ;;  %v600_v36 = vmul.f32 %v1021_v22, %v1053_v41  ;;  %v636_v38 = vmul.f32 %v1028_v26, %v1116_v32  ;;  %v437_v40 = vmul.f32 %v1001_v12, %v413_v50 }
  0x22   : > { %v522_v30 = vadd.f32 %v506_v34, %v486_v14  ;;  %v361_v39 = vadd.f32 %v345_v21, %v325_v27  ;;  %v452_v34 = vadd.f32 %v436_v5, %v396_v31  ;;  %v290_v46 = vadd.f32 %v991_v8, %v1087_v63 }
  0x23   : > { %v487_v37 = vadd.f32 %v471_v54, %v451_v24  ;;  %v310_v35 = vmul.f32 %v993_v9, %v1024_v23  ;;  %v473_v51 = vmul.f32 %v1003_v13, %v1072_v53  ;;  %v346_v54 = vmul.f32 %v995_v10, %v1087_v63 }
  0x24   : > { %v578_v45 = vadd.f32 %v562_v42, %v522_v30  ;;  %v397_v49 = vadd.f32 %v381_v28, %v361_v39  ;;  %v488_v56 = vadd.f32 %v472_v19, %v452_v34  ;;  %v1137_v42 = vld [vmem:[%s997_s6 + $0x50] sm:$0xff]  ;;  %v382_v58 = vmul.f32 %v999_v11, %v1132_v52 }
  0x25   : > { %v523_v48 = vadd.f32 %v507_v59, %v487_v37  ;;  %v326_v57 = vadd.f32 %v310_v35, %v290_v46  ;;  %v509_v0 = vmul.f32 %v1007_v16, %v1137_v42  ;;  %v438_v5 = vmul.f32 %v1001_v12, %v1033_v29  ;;  %v1173_v30 = vld [vmem:[%s997_s6 + $0x52] sm:$0xff] }
  0x26   : > { %v614_v50 = vadd.f32 %v598_v43, %v578_v45  ;;  %v453_v59 = vadd.f32 %v437_v40, %v397_v49  ;;  %v565_v43 = vmul.f32 %v1009_v17, %v541_v55  ;;  %v524_v3 = vadd.f32 %v508_v25, %v488_v56  ;;  %v1168_v25 = vld [vmem:[%s997_s6 + $0x69] sm:$0xff] }
  0x27   : > { %v579_v23 = vadd.f32 %v563_v61, %v523_v48  ;;  %v362_v4 = vadd.f32 %v346_v54, %v326_v57  ;;  %v601_v61 = vmul.f32 %v1021_v22, %v1082_v60  ;;  %v474_v14 = vmul.f32 %v1003_v13, %v1100_v18  ;;  %v1196_v54 = vld [vmem:[%s997_s6 + $0x79] sm:$0xff]  ;;  %v1201_v56 = vld [vmem:[%s997_s6 + $0x62] sm:$0xff] }
  0x28   : > { %v650_v2 = vadd.f32 %v1065_v47, %v614_v50  ;;  %v489_v7 = vadd.f32 %v473_v51, %v453_v59  ;;  %v580_v55 = vadd.f32 %v564_v33, %v524_v3  ;;  %v291_v19 = vadd.f32 %v991_v8, %v1105_v20  ;;  %v1204_v57 = vld [vmem:[%s997_s6 + $0x68] sm:$0xff] }
  0x29   : > { %v615_v6 = vadd.f32 %v599_v62, %v579_v23  ;;  %v398_v47 = vadd.f32 %v382_v58, %v362_v4  ;;  %v311_v29 = vmul.f32 %v993_v9, %v1058_v44  ;;  %v510_v24 = vmul.f32 %v1007_v16, %v1159_v15 }
  0x2a   : > { %667 = vst.msk [vmem:[%s1144_s19] sm:$0xff] %vm666_vm0, %v650_v2  ;;  %v525_v21 = vadd.f32 %v509_v0, %v489_v7  ;;  %v347_v27 = vmul.f32 %v995_v10, %v1105_v20  ;;  %v616_v28 = vadd.f32 %v600_v36, %v580_v55  ;;  %v383_v37 = vmul.f32 %v999_v11, %v1168_v25 }
  0x2b   : > { %v651_v62 = vadd.f32 %v635_v1, %v615_v6  ;;  %v454_v31 = vadd.f32 %v438_v5, %v398_v47  ;;  %v327_v33 = vadd.f32 %v311_v29, %v291_v19  ;;  %v637_v1 = vmul.f32 %v1028_v26, %v1173_v30  ;;  %v1234_v29 = vld [vmem:[%s997_s6 + $0x81] sm:$0xff] }
  0x2c   : > { %v581_v44 = vadd.f32 %v565_v43, %v525_v21  ;;  %v566_v39 = vmul.f32 %v1009_v17, %v1053_v41  ;;  %v652_v36 = vadd.f32 %v636_v38, %v616_v28  ;;  %v439_v34 = vmul.f32 %v1001_v12, %v1072_v53 }
  0x2d   : > { %668 = vst.msk [vmem:[%s1144_s19 + $0x8] sm:$0xff] %vm666_vm0, %v651_v62  ;;  %v490_v40 = vadd.f32 %v474_v14, %v454_v31  ;;  %v363_v45 = vadd.f32 %v347_v27, %v327_v33  ;;  %v602_v35 = vmul.f32 %v1021_v22, %v1116_v32  ;;  %v292_v48 = vadd.f32 %v991_v8, %v1132_v52 }
  0x2e   : > { %v617_v46 = vadd.f32 %v601_v61, %v581_v44  ;;  %v312_v49 = vmul.f32 %v993_v9, %v1087_v63  ;;  %669 = vst.msk [vmem:[%s1144_s19 + $0x10] sm:$0xff] %vm666_vm0, %v652_v36  ;;  %v475_v51 = vmul.f32 %v1003_v13, %v1137_v42  ;;  %v348_v53 = vmul.f32 %v995_v10, %v1132_v52  ;;  %v1221_v61 = vld [vmem:[%s997_s6 + $0x6a] sm:$0xff] }
  0x2f   : > { %v526_v41 = vadd.f32 %v510_v24, %v490_v40  ;;  %v399_v38 = vadd.f32 %v383_v37, %v363_v45  ;;  %v384_v58 = vmul.f32 %v999_v11, %v1196_v54  ;;  %v638_v59 = vmul.f32 %v1028_v26, %v1201_v56 }
  0x30   : > { %v653_v50 = vadd.f32 %v637_v1, %v617_v46  ;;  %v328_v63 = vadd.f32 %v312_v49, %v292_v48  ;;  %v511_v43 = vmul.f32 %v1007_v16, %v1204_v57  ;;  %v567_v2 = vmul.f32 %v1009_v17, %v1082_v60  ;;  %v1266_v49 = vld [vmem:[%s997_s6 + $0x80] sm:$0xff] }
  0x31   : > { %v582_v23 = vadd.f32 %v566_v39, %v526_v41  ;;  %v455_v0 = vadd.f32 %v439_v34, %v399_v38  ;;  %v440_v4 = vmul.f32 %v1001_v12, %v1100_v18  ;;  %v293_v5 = vadd.f32 %v991_v8, %v1168_v25  ;;  %v1258_v34 = vld [vmem:[%s997_s6 + $0x91] sm:$0xff] }
  0x32   : > { %670 = vst.msk [vmem:[%s1144_s19 + $0x18] sm:$0xff] %vm666_vm0, %v653_v50  ;;  %v364_v3 = vadd.f32 %v348_v53, %v328_v63  ;;  %v313_v14 = vmul.f32 %v993_v9, %v1105_v20  ;;  %v349_v55 = vmul.f32 %v995_v10, %v1168_v25  ;;  %v603_v60 = vmul.f32 %v1021_v22, %v1173_v30  ;;  %v1237_v20 = vld [vmem:[%s997_s6 + $0x78] sm:$0xff] }
  0x33   : > { %v618_v6 = vadd.f32 %v602_v35, %v582_v23  ;;  %v491_v7 = vadd.f32 %v475_v51, %v455_v0  ;;  %v639_v18 = vmul.f32 %v1028_v26, %v1221_v61  ;;  %v476_v19 = vmul.f32 %v1003_v13, %v1159_v15  ;;  %v1263_v35 = vld [vmem:[%s997_s6 + $0x7a] sm:$0xff] }
  0x34   : > { %v400_v47 = vadd.f32 %v384_v58, %v364_v3  ;;  %v329_v24 = vadd.f32 %v313_v14, %v293_v5  ;;  %v385_v27 = vmul.f32 %v999_v11, %v1234_v29  ;;  %v512_v31 = vmul.f32 %v1007_v16, %v1237_v20 }
  0x35   : > { %v654_v62 = vadd.f32 %v638_v59, %v618_v6  ;;  %v527_v21 = vadd.f32 %v511_v43, %v491_v7  ;;  %v568_v33 = vmul.f32 %v1009_v17, %v1116_v32  ;;  %v441_v37 = vmul.f32 %v1001_v12, %v1137_v42  ;;  %v1294_v7 = vld [vmem:[%s997_s6 + $0x99] sm:$0xff] }
  0x36   : > { %v456_v28 = vadd.f32 %v440_v4, %v400_v47  ;;  %v365_v1 = vadd.f32 %v349_v55, %v329_v24  ;;  %v294_v39 = vadd.f32 %v991_v8, %v1196_v54  ;;  %v314_v36 = vmul.f32 %v993_v9, %v1132_v52  ;;  %v1287_v4 = vld [vmem:[%s997_s6 + $0x82] sm:$0xff]  ;;  %v1299_v55 = vld [vmem:[%s997_s6 + $0x90] sm:$0xff] }
  0x37   : > { %671 = vst.msk [vmem:[%s1144_s19 + $0x20] sm:$0xff] %vm666_vm0, %v654_v62  ;;  %v583_v44 = vadd.f32 %v567_v2, %v527_v21  ;;  %v604_v45 = vmul.f32 %v1021_v22, %v1201_v56  ;;  %v477_v32 = vmul.f32 %v1003_v13, %v1204_v57  ;;  %v350_v42 = vmul.f32 %v995_v10, %v1196_v54 }
  0x38   : > { %v492_v40 = vadd.f32 %v476_v19, %v456_v28  ;;  %v401_v48 = vadd.f32 %v385_v27, %v365_v1  ;;  %v330_v52 = vadd.f32 %v314_v36, %v294_v39  ;;  %v386_v41 = vmul.f32 %v999_v11, %v1258_v34 }
  0x39   : > { %v619_v46 = vadd.f32 %v603_v60, %v583_v44  ;;  %v640_v51 = vmul.f32 %v1028_v26, %v1263_v35  ;;  %v513_v53 = vmul.f32 %v1007_v16, %v1266_v49  ;;  %v569_v50 = vmul.f32 %v1009_v17, %v1173_v30  ;;  %v1312_v44 = vld [vmem:[%s997_s6 + $0x92] sm:$0xff] }
  0x3a   : > { %v528_v38 = vadd.f32 %v512_v31, %v492_v40  ;;  %v457_v58 = vadd.f32 %v441_v37, %v401_v48  ;;  %v366_v23 = vadd.f32 %v350_v42, %v330_v52  ;;  %v442_v59 = vmul.f32 %v1001_v12, %v1159_v15  ;;  %v1330_v42 = vld [vmem:[%s997_s6 + $0x98] sm:$0xff] }
  0x3b   : > { %v655_v63 = vadd.f32 %v639_v18, %v619_v46  ;;  %v295_v43 = vadd.f32 %v991_v8, %v1234_v29  ;;  %v315_v2 = vmul.f32 %v993_v9, %v1168_v25  ;;  %v351_v3 = vmul.f32 %v995_v10, %v1234_v29 }
  0x3c   : > { %v584_v0 = vadd.f32 %v568_v33, %v528_v38  ;;  %v493_v30 = vadd.f32 %v477_v32, %v457_v58  ;;  %v605_v5 = vmul.f32 %v1021_v22, %v1221_v61  ;;  %v402_v6 = vadd.f32 %v386_v41, %v366_v23 }
  0x3d   : > { %672 = vst.msk [vmem:[%s1144_s19 + $0x28] sm:$0xff] %vm666_vm0, %v655_v63  ;;  %v478_v15 = vmul.f32 %v1003_v13, %v1237_v20  ;;  %v641_v25 = vmul.f32 %v1028_v26, %v1287_v4  ;;  %v331_v60 = vadd.f32 %v315_v2, %v295_v43  ;;  %v387_v18 = vmul.f32 %v999_v11, %v1294_v7 }
  0x3e   : > { %v620_v14 = vadd.f32 %v604_v45, %v584_v0  ;;  %v529_v47 = vadd.f32 %v513_v53, %v493_v30  ;;  %v458_v19 = vadd.f32 %v442_v59, %v402_v6  ;;  %v514_v62 = vmul.f32 %v1007_v16, %v1299_v55  ;;  %v1327_v45 = vld [vmem:[%s997_s6 + $0xa9] sm:$0xff]  ;;  %v1343_v59 = vld [vmem:[%s997_s6 + $0x9a] sm:$0xff]  ;;  %v1361_v6 = vld [vmem:[%s997_s6 + $0xb1] sm:$0xff] }
  0x3f   : > { %v570_v21 = vmul.f32 %v1009_v17, %v1201_v56  ;;  %v367_v27 = vadd.f32 %v351_v3, %v331_v60  ;;  %v443_v28 = vmul.f32 %v1001_v12, %v1204_v57  ;;  %v296_v31 = vadd.f32 %v991_v8, %v1258_v34  ;;  %v1356_v30 = vld [vmem:[%s997_s6 + $0xa8] sm:$0xff] }
  0x40   : > { %v656_v24 = vadd.f32 %v640_v51, %v620_v14  ;;  %v585_v33 = vadd.f32 %v569_v50, %v529_v47  ;;  %v494_v37 = vadd.f32 %v478_v15, %v458_v19  ;;  %v316_v1 = vmul.f32 %v993_v9, %v1196_v54 }
  0x41   : > { %v352_v39 = vmul.f32 %v995_v10, %v1258_v34  ;;  %v606_v56 = vmul.f32 %v1021_v22, %v1263_v35  ;;  %v642_v57 = vmul.f32 %v1028_v26, %v1312_v44  ;;  %v403_v36 = vadd.f32 %v387_v18, %v367_v27 }
  0x42   : > { %673 = vst.msk [vmem:[%s1144_s19 + $0x30] sm:$0xff] %vm666_vm0, %v656_v24  ;;  %v479_v40 = vmul.f32 %v1003_v13, %v1266_v49  ;;  %v621_v32 = vadd.f32 %v605_v5, %v585_v33  ;;  %v530_v54 = vadd.f32 %v514_v62, %v494_v37  ;;  %v332_v46 = vadd.f32 %v316_v1, %v296_v31  ;;  %v276_v33 = vld [vmem:[%s997_s6 + $0xc1] sm:$0xff]  ;;  %v1385_v1 = vld [vmem:[%s997_s6 + $0xaa] sm:$0xff] }
  0x43   : > { %v388_v48 = vmul.f32 %v999_v11, %v1327_v45  ;;  %v459_v52 = vadd.f32 %v443_v28, %v403_v36  ;;  %v515_v41 = vmul.f32 %v1007_v16, %v1330_v42  ;;  %v571_v38 = vmul.f32 %v1009_v17, %v1221_v61 }
  0x44   : > { %v444_v51 = vmul.f32 %v1001_v12, %v1237_v20  ;;  %v657_v53 = vadd.f32 %v641_v25, %v621_v32  ;;  %v586_v50 = vadd.f32 %v570_v21, %v530_v54  ;;  %v368_v63 = vadd.f32 %v352_v39, %v332_v46 }
  0x45   : > { %v297_v58 = vadd.f32 %v991_v8, %v1294_v7  ;;  %v495_v23 = vadd.f32 %v479_v40, %v459_v52  ;;  %v607_v0 = vmul.f32 %v1021_v22, %v1287_v4  ;;  %v317_v43 = vmul.f32 %v993_v9, %v1234_v29 }
  0x46   : > { %v353_v61 = vmul.f32 %v995_v10, %v1294_v7  ;;  %674 = vst.msk [vmem:[%s1144_s19 + $0x38] sm:$0xff] %vm666_vm0, %v657_v53  ;;  %v622_v20 = vadd.f32 %v606_v56, %v586_v50  ;;  %v643_v2 = vmul.f32 %v1028_v26, %v1343_v59  ;;  %v404_v3 = vadd.f32 %v388_v48, %v368_v63  ;;  %v1388_v56 = vld [vmem:[%s997_s6 + $0xb0] sm:$0xff] }
  0x47   : > { %v480_v5 = vmul.f32 %v1003_v13, %v1299_v55  ;;  %v531_v15 = vadd.f32 %v515_v41, %v495_v23  ;;  %v516_v29 = vmul.f32 %v1007_v16, %v1356_v30  ;;  %v333_v14 = vadd.f32 %v317_v43, %v297_v58  ;;  %v1408_v63 = vld [vmem:[%s997_s6 + $0xb2] sm:$0xff] }
  0x48   : > { %v389_v25 = vmul.f32 %v999_v11, %v1361_v6  ;;  %v658_v60 = vadd.f32 %v642_v57, %v622_v20  ;;  %v460_v18 = vadd.f32 %v444_v51, %v404_v3  ;;  %v572_v47 = vmul.f32 %v1009_v17, %v1263_v35 }
  0x49   : > { %v445_v19 = vmul.f32 %v1001_v12, %v1266_v49  ;;  %v587_v62 = vadd.f32 %v571_v38, %v531_v15  ;;  %v369_v21 = vadd.f32 %v353_v61, %v333_v14  ;;  %v298_v24 = vadd.f32 %v991_v8, %v1327_v45  ;;  %v426_v61 = vld [vmem:[%s997_s6 + $0xc0] sm:$0xff] }
  0x4a   : > { %v318_v27 = vmul.f32 %v993_v9, %v1258_v34  ;;  %675 = vst.msk [vmem:[%s1144_s19 + $0x40] sm:$0xff] %vm666_vm0, %v658_v60  ;;  %v496_v28 = vadd.f32 %v480_v5, %v460_v18  ;;  %v608_v31 = vmul.f32 %v1021_v22, %v1312_v44  ;;  %v481_v35 = vmul.f32 %v1003_v13, %v1330_v42  ;;  %v278_v18 = vld [vmem:[%s997_s6 + $0xd9] sm:$0xff] }
  0x4b   : > { %v354_v49 = vmul.f32 %v995_v10, %v1327_v45  ;;  %v623_v37 = vadd.f32 %v607_v0, %v587_v62  ;;  %v405_v39 = vadd.f32 %v389_v25, %v369_v21  ;;  %v390_v57 = vmul.f32 %v999_v11, %v276_v33  ;;  %v277_v0 = vld [vmem:[%s997_s6 + $0xc9] sm:$0xff] }
  0x4c   : > { %v334_v34 = vadd.f32 %v318_v27, %v298_v24  ;;  %v532_v36 = vadd.f32 %v516_v29, %v496_v28  ;;  %v644_v40 = vmul.f32 %v1028_v26, %v1385_v1  ;;  %v517_v32 = vmul.f32 %v1007_v16, %v1388_v56 }
  0x4d   : > { %v573_v54 = vmul.f32 %v1009_v17, %v1287_v4  ;;  %v659_v46 = vadd.f32 %v643_v2, %v623_v37  ;;  %v461_v48 = vadd.f32 %v445_v19, %v405_v39  ;;  %v446_v41 = vmul.f32 %v1001_v12, %v1299_v55 }
  0x4e   : > { %v370_v52 = vadd.f32 %v354_v49, %v334_v34  ;;  %v588_v38 = vadd.f32 %v572_v47, %v532_v36  ;;  %v299_v51 = vadd.f32 %v991_v8, %v1361_v6  ;;  %v319_v53 = vmul.f32 %v993_v9, %v1294_v7  ;;  %v427_v49 = vld [vmem:[%s997_s6 + $0xc8] sm:$0xff] }
  0x4f   : > { %v355_v50 = vmul.f32 %v995_v10, %v1361_v6  ;;  %676 = vst.msk [vmem:[%s1144_s19 + $0x48] sm:$0xff] %vm666_vm0, %v659_v46  ;;  %v497_v4 = vadd.f32 %v481_v35, %v461_v48  ;;  %v609_v58 = vmul.f32 %v1021_v22, %v1343_v59  ;;  %v482_v23 = vmul.f32 %v1003_v13, %v1356_v30  ;;  %v554_v35 = vld [vmem:[%s997_s6 + $0xc2] sm:$0xff] }
  0x50   : > { %v406_v55 = vadd.f32 %v390_v57, %v370_v52  ;;  %v624_v43 = vadd.f32 %v608_v31, %v588_v38  ;;  %v645_v7 = vmul.f32 %v1028_v26, %v1408_v63  ;;  %v335_v20 = vadd.f32 %v319_v53, %v299_v51 }
  0x51   : > { %v391_v2 = vmul.f32 %v999_v11, %v277_v0  ;;  %v533_v3 = vadd.f32 %v517_v32, %v497_v4  ;;  %v518_v15 = vmul.f32 %v1007_v16, %v426_v61  ;;  %v574_v29 = vmul.f32 %v1009_v17, %v1312_v44 }
  0x52   : > { %v462_v5 = vadd.f32 %v446_v41, %v406_v55  ;;  %v660_v14 = vadd.f32 %v644_v40, %v624_v43  ;;  %v371_v25 = vadd.f32 %v355_v50, %v335_v20  ;;  %v447_v60 = vmul.f32 %v1001_v12, %v1330_v42  ;;  %v428_v41 = vld [vmem:[%s997_s6 + $0xd8] sm:$0xff] }
  0x53   : > { %v300_v47 = vadd.f32 %v991_v8, %v276_v33  ;;  %v589_v19 = vadd.f32 %v573_v54, %v533_v3  ;;  %v320_v21 = vmul.f32 %v993_v9, %v1327_v45  ;;  %v356_v24 = vmul.f32 %v995_v10, %v276_v33  ;;  %v279_v54 = vld [vmem:[%s997_s6 + $0xe1] sm:$0xff] }
  0x54   : > { %v498_v62 = vadd.f32 %v482_v23, %v462_v5  ;;  %677 = vst.msk [vmem:[%s1144_s19 + $0x50] sm:$0xff] %vm666_vm0, %v660_v14  ;;  %v610_v44 = vmul.f32 %v1021_v22, %v1385_v1  ;;  %v407_v27 = vadd.f32 %v391_v2, %v371_v25  ;;  %v483_v42 = vmul.f32 %v1003_v13, %v1388_v56  ;;  %v556_v3 = vld [vmem:[%s997_s6 + $0xda] sm:$0xff] }
  0x55   : > { %v625_v28 = vadd.f32 %v609_v58, %v589_v19  ;;  %v336_v37 = vadd.f32 %v320_v21, %v300_v47  ;;  %v392_v45 = vmul.f32 %v999_v11, %v278_v18  ;;  %v646_v33 = vmul.f32 %v1028_v26, %v554_v35 }
  0x56   : > { %v534_v31 = vadd.f32 %v518_v15, %v498_v62  ;;  %v463_v39 = vadd.f32 %v447_v60, %v407_v27  ;;  %v519_v34 = vmul.f32 %v1007_v16, %v427_v49  ;;  %v448_v57 = vmul.f32 %v1001_v12, %v1356_v30 }
  0x57   : > { %v661_v36 = vadd.f32 %v645_v7, %v625_v28  ;;  %v372_v32 = vadd.f32 %v356_v24, %v336_v37  ;;  %v301_v46 = vadd.f32 %v991_v8, %v277_v0  ;;  %v575_v52 = vmul.f32 %v1009_v17, %v1343_v59 }
  0x58   : > { %v590_v40 = vadd.f32 %v574_v29, %v534_v31  ;;  %v499_v48 = vadd.f32 %v483_v42, %v463_v39  ;;  %v321_v38 = vmul.f32 %v993_v9, %v1361_v6  ;;  %v357_v51 = vmul.f32 %v995_v10, %v277_v0  ;;  %v555_v9 = vld [vmem:[%s997_s6 + $0xca] sm:$0xff] }
  0x59   : > { %678 = vst.msk [vmem:[%s1144_s19 + $0x58] sm:$0xff] %vm666_vm0, %v661_v36  ;;  %v408_v53 = vadd.f32 %v392_v45, %v372_v32  ;;  %v484_v50 = vmul.f32 %v1003_v13, %v426_v61  ;;  %v611_v8 = vmul.f32 %v1021_v22, %v1408_v63  ;;  %v393_v58 = vmul.f32 %v999_v11, %v279_v54  ;;  %v429_v11 = vld [vmem:[%s997_s6 + $0xe0] sm:$0xff] }
  0x5a   : > { %v626_v30 = vadd.f32 %v610_v44, %v590_v40  ;;  %v535_v4 = vadd.f32 %v519_v34, %v499_v48  ;;  %v337_v59 = vadd.f32 %v321_v38, %v301_v46  ;;  %v520_v10 = vmul.f32 %v1007_v16, %v428_v41 }
  0x5b   : > { %v464_v6 = vadd.f32 %v448_v57, %v408_v53  ;;  %v647_v0 = vmul.f32 %v1028_v26, %v555_v9  ;;  %v449_v7 = vmul.f32 %v1001_v12, %v1388_v56  ;;  %v576_v20 = vmul.f32 %v1009_v17, %v1385_v1 }
  0x5c   : > { %v662_v55 = vadd.f32 %v646_v33, %v626_v30  ;;  %v591_v23 = vadd.f32 %v575_v52, %v535_v4  ;;  %v373_v43 = vadd.f32 %v357_v51, %v337_v59  ;;  %v485_v15 = vmul.f32 %v1003_v13, %v427_v49  ;;  %v557_v13 = vld [vmem:[%s997_s6 + $0xe2] sm:$0xff] }
  0x5d   : > { %v500_v61 = vadd.f32 %v484_v50, %v464_v6  ;;  %v612_v14 = vmul.f32 %v1021_v22, %v554_v35  ;;  %v521_v56 = vmul.f32 %v1007_v16, %v429_v11  ;;  %v648_v18 = vmul.f32 %v1028_v26, %v556_v3 }
  0x5e   : > { %679 = vst.msk [vmem:[%s1144_s19 + $0x60] sm:$0xff] %vm666_vm0, %v662_v55  ;;  %v627_v2 = vadd.f32 %v611_v8, %v591_v23  ;;  %v409_v5 = vadd.f32 %v393_v58, %v373_v43  ;;  %v577_v47 = vmul.f32 %v1009_v17, %v1408_v63  ;;  %v613_v21 = vmul.f32 %v1021_v22, %v555_v9 }
  0x5f   : > { %v536_v29 = vadd.f32 %v520_v10, %v500_v61  ;;  %v649_v27 = vmul.f32 %v1028_v26, %v557_v13 }
  0x60   : > { %v663_v25 = vadd.f32 %v647_v0, %v627_v2  ;;  %v465_v12 = vadd.f32 %v449_v7, %v409_v5 }
  0x61   : > { %v592_v60 = vadd.f32 %v576_v20, %v536_v29 }
  0x62   : > { %680 = vst.msk [vmem:[%s1144_s19 + $0x68] sm:$0xff] %vm666_vm0, %v663_v25  ;;  %v501_v1 = vadd.f32 %v485_v15, %v465_v12 }
  0x63   : > { %v628_v19 = vadd.f32 %v612_v14, %v592_v60 }
  0x64   : > { %v537_v62 = vadd.f32 %v521_v56, %v501_v1 }
  0x65   : > { %v664_v24 = vadd.f32 %v648_v18, %v628_v19 }
  0x66   : > { %v593_v44 = vadd.f32 %v577_v47, %v537_v62 }
  0x67   : > { %681 = vst.msk [vmem:[%s1144_s19 + $0x70] sm:$0xff] %vm666_vm0, %v664_v24 }
  0x68   : > { %v629_v16 = vadd.f32 %v613_v21, %v593_v44 }
  0x6a   : > { %v665_v42 = vadd.f32 %v649_v27, %v629_v16 }
  0x6c   : > { %682 = vst.msk [vmem:[%s1144_s19 + $0x78] sm:$0xff] %vm666_vm0, %v665_v42 }
  0x6d PF: > { %s13_s16 = sadd.s32 1, %s917_s16   ;;  %s1502_s12 = smov %s909_s14 }
  0x6e   : > { %p10_p7 = scmp.ge.s32.totalorder %s13_s16, 6   ;;  %s1503_s13 = smov %s913_s15 }
  0x6f   : > { %s1504_s14 = smov %s1507_s17  ;;  %s1505_s15 = smov %s1511_s18 }
  0x70   :  { %12 = sbr.rel (!%p10_p7) target bundleno = 3 (0x3), region = 69 }

</bundles_post_ra>
